<compile_context>
chip_gen: v5e
topology: v5e:2x2
jax: 0.10.0
libtpu: 0.0.40
codegen_flags: <defaults>
</compile_context>

<pallas_src>
import math

import numpy as np

import jax
import jax.numpy as jnp
from jax.experimental import pallas as pl
from jax.experimental.pallas import tpu as pltpu


# ---------------------------------------------------------------------------
# HKO config constants (cfg.HKO.EVALUATION.*) reproduced in-script.
# ---------------------------------------------------------------------------
BALANCING_WEIGHTS = (1.0, 1.0, 2.0, 5.0, 10.0, 30.0)
RAIN_THRESHOLDS = (0.5, 2.0, 5.0, 10.0, 30.0)


def rainfall_to_pixel(rainfall_intensity, a=58.53, b=1.56):
    """Standard HKO-7 rainfall -> pixel-value conversion (Z-R relation)."""
    dBR = math.log10(rainfall_intensity) * 10.0
    dBZ = dBR * b + 10.0 * math.log10(a)
    return (dBZ + 10.0) / 70.0


PIXEL_THRESHOLDS = tuple(rainfall_to_pixel(t) for t in RAIN_THRESHOLDS)

# Deduplicated (threshold, level-weight) pairs for the nested-select weight chain.
# The first threshold's weight step is 0, so it drops out.
_CHAIN = tuple(
    (PIXEL_THRESHOLDS[i], BALANCING_WEIGHTS[i + 1])
    for i in range(len(PIXEL_THRESHOLDS))
    if BALANCING_WEIGHTS[i + 1] != BALANCING_WEIGHTS[i]
)


# ---------------------------------------------------------------------------
# Device / precision helpers.
# ---------------------------------------------------------------------------
def _device_kind():
    try:
        return jax.devices()[0].device_kind.lower()
    except Exception:
        return ""


def _has_bf16_vector_unit():
    # v6e and newer have bf16 VALU; v2-v5 do not (run the weight chain in f32 there).
    kind = _device_kind()
    return not any(s in kind for s in ("v2", "v3", "v4", "v5"))


def _vmem_limit_bytes():
    # v7x has only 64 MiB physical VMEM per core -> cap at 48 MiB; 128-MiB
    # generations (v4/v5e/v6e) get 96 MiB.  Clamp with get_tpu_info when available.
    kind = _device_kind()
    limit = 96 << 20 if any(s in kind for s in ("v4", "v5", "v6")) else 48 << 20
    try:
        cap = int(getattr(pltpu.get_tpu_info(), "vmem_capacity_bytes"))
        limit = min(limit, cap * 3 // 4)
    except Exception:
        pass
    return limit


def _ceil_to_bf16(value):
    """Smallest bf16 >= float32(value) (value > 0), so a bf16 compare against it
    is bit-identical to comparing the f32-upcast value against float32(value)."""
    v32 = np.float32(value)
    b = np.asarray([v32], dtype=jnp.bfloat16)
    if np.float32(b[0]) < v32:
        u = b.view(np.uint16)
        u[0] += 1  # positive -> next representable bf16 up
    return b[0]


def _sublane_multiple(dtype):
    # Legal second-to-last block multiple for a packed dtype: f32->8, bf16->16, u8->32.
    return 32 // jnp.dtype(dtype).itemsize


# ---------------------------------------------------------------------------
# Kernel builder: weighted MSE / MAE partial row sums, accumulated over feat tiles.
#   inputs  : (TR, TF) tiles of the flattened pixels (original dtypes)
#   outputs : (TR, 1) f32 mse-sum and (TR, 1) f32 mae-sum (separate refs, no concat)
# ---------------------------------------------------------------------------
def _build_kernel(tile_feat, feat_valid, mask_is_float, cmp_dtype):
    if cmp_dtype == jnp.bfloat16:
        chain = tuple((_ceil_to_bf16(t), np.asarray(v, dtype=jnp.bfloat16))
                      for t, v in _CHAIN)
        base = np.asarray(BALANCING_WEIGHTS[0], dtype=jnp.bfloat16)
        zero = np.asarray(0.0, dtype=jnp.bfloat16)
    else:
        chain = tuple((np.float32(t), np.float32(v)) for t, v in _CHAIN)
        base = np.float32(BALANCING_WEIGHTS[0])
        zero = np.float32(0.0)

    def kernel(inp_ref, tgt_ref, mask_ref, mse_ref, mae_ref):
        k = pl.program_id(1)  # feature (reduction) axis, innermost / "arbitrary"

        @pl.when(k == 0)
        def _init():
            mse_ref[...] = jnp.zeros_like(mse_ref)
            mae_ref[...] = jnp.zeros_like(mae_ref)

        t_raw = tgt_ref[...]
        t_cmp = t_raw.astype(cmp_dtype)

        # Balancing weights as a nested select chain (highest level wins).
        w = jnp.where(t_cmp >= chain[0][0], chain[0][1], base)
        for thr, val in chain[1:]:
            w = jnp.where(t_cmp >= thr, val, w)

        # Mask: single select for bool/int masks (exact for 0/1 masks, as in HKO);
        # multiply for float masks to preserve the original `w * mask.float()`.
        m = mask_ref[...]
        if mask_is_float:
            w = w.astype(jnp.float32) * m.astype(jnp.float32)
        else:
            mb = m if m.dtype == jnp.bool_ else (m != 0)
            w = jnp.where(mb, w, zero).astype(jnp.float32)

        x = inp_ref[...].astype(jnp.float32)
        d = x - t_raw.astype(jnp.float32)
        ad = jnp.abs(d)

        if feat_valid is not None:
            # Partial tail block: zero contributions from out-of-range lanes
            # (replaces the former jnp.pad of all three inputs in HBM).
            col = k * tile_feat + jax.lax.broadcasted_iota(jnp.int32, ad.shape, 1)
            keep = col < feat_valid
            ad = jnp.where(keep, ad, 0.0)
            w = jnp.where(keep, w, 0.0)

        wad = w * ad  # reused by both reductions
        mae_ref[...] += jnp.sum(wad, axis=-1, keepdims=True)
        mse_ref[...] += jnp.sum(wad * ad, axis=-1, keepdims=True)

    return kernel


# ---------------------------------------------------------------------------
# Tiling decisions.
# ---------------------------------------------------------------------------
def _choose_fold(rows, feat, row_mult, min_row_blocks=2):
    """Smallest divisor G of feat so rows*G supports >= min_row_blocks sublane-aligned
    row blocks (keeps both v7x TensorCores fed).  G=1 when rows is already fine."""
    target = min_row_blocks * row_mult
    if rows % row_mult == 0 and rows >= target:
        return 1
    relaxed = 1
    for g in range(2, min(feat, 4096) + 1):
        if feat % g:
            continue
        r = rows * g
        if r % row_mult or r < target:
            continue
        if feat // g >= 128:
            return g
        if relaxed == 1:
            relaxed = g
    return relaxed


def _choose_tiles(rows, feat, row_mult, elem_budget, min_row_blocks=2):
    cands = sorted({d for d in range(row_mult, rows + 1, row_mult) if rows % d == 0}
                   | {rows})
    pref = [d for d in cands if rows // d >= min_row_blocks] or cands

    # Largest row tile (keeping >= min_row_blocks row blocks when possible) such that
    # the full feature extent fits the budget -> lane-dense, no tail masking.
    for tr in sorted(pref, reverse=True):
        if tr * feat <= elem_budget:
            return tr, feat

    # Feature axis must be tiled: smallest row tile, widest multiple-of-128 feat tile.
    tr = min(pref)
    cap = max(128, (elem_budget // tr) // 128 * 128)
    tf = 0
    if feat % 128 == 0:
        c = cap
        while c >= 128:
            if feat % c == 0:
                tf = c
                break
            c -= 128
    if tf < min(cap, 512):
        tf = cap  # accept a partial tail block; masked inside the kernel
    return tr, tf


# ---------------------------------------------------------------------------
# pallas_call wrapper: per-row weighted MSE / MAE sums.
# ---------------------------------------------------------------------------
def _row_sums(x2d, t2d, m2d, *, elem_budget=None, min_row_blocks=2):
    rows, feat = x2d.shape
    row_mult = max(_sublane_multiple(a.dtype) for a in (x2d, t2d, m2d))

    vmem_limit = _vmem_limit_bytes()
    if elem_budget is None:
        narrow = max(x2d.dtype.itemsize, t2d.dtype.itemsize) <= 2
        elem_budget = vmem_limit // (64 if narrow else 96)

    tile_rows, tile_feat = _choose_tiles(rows, feat, row_mult, elem_budget,
                                         min_row_blocks)
    n_feat_blocks = pl.cdiv(feat, tile_feat)
    feat_valid = None if feat % tile_feat == 0 else feat

    cmp_dtype = jnp.float32
    if t2d.dtype == jnp.bfloat16 and _has_bf16_vector_unit():
        cmp_dtype = jnp.bfloat16  # halves the weight-chain op count on v6e/v7x

    mask_is_float = jnp.issubdtype(m2d.dtype, jnp.floating)
    kernel = _build_kernel(tile_feat, feat_valid, mask_is_float, cmp_dtype)

    in_spec = pl.BlockSpec((tile_rows, tile_feat), lambda i, k: (i, k))
    out_spec = pl.BlockSpec((tile_rows, 1), lambda i, k: (i, 0))

    mse, mae = pl.pallas_call(
        kernel,
        out_shape=(jax.ShapeDtypeStruct((rows, 1), jnp.float32),
                   jax.ShapeDtypeStruct((rows, 1), jnp.float32)),
        grid_spec=pltpu.PrefetchScalarGridSpec(
            num_scalar_prefetch=0,
            grid=(rows // tile_rows, n_feat_blocks),
            in_specs=[in_spec, in_spec, in_spec],
            out_specs=(out_spec, out_spec),
        ),
        compiler_params=pltpu.CompilerParams(
            dimension_semantics=("parallel", "arbitrary"),
            vmem_limit_bytes=vmem_limit,
        ),
    )(x2d, t2d, m2d)
    return mse[:, 0], mae[:, 0]


# ---------------------------------------------------------------------------
# Wrapper reproducing Weighted_MSE_MAE_hko.forward
# ---------------------------------------------------------------------------
def weighted_mse_mae_hko(
    inp,
    tgt,
    mask,
    mse_weight=1.0,
    mae_weight=1.0,
    normal_loss_global_scale=5e-05,
    LAMBDA=None,
    fold=None,               # testing knob: override the feat->rows fold factor
    block_elem_budget=None,  # testing knob: override the per-block element budget
):
    # Tensors are (S, B, C, H, W); reduction is over dims (2, 3, 4).
    S, B, C, H, W = inp.shape
    rows = S * B
    feat = C * H * W

    # Recommended: pass the mask as uint8/int8 so it streams through HBM untouched.
    # Bool masks are converted once here (compat fallback) -- costs one extra HBM
    # pass over the 1-byte mask.
    if mask.dtype == jnp.bool_:
        mask = mask.astype(jnp.uint8)

    row_mult = max(_sublane_multiple(a.dtype) for a in (inp, tgt, mask))
    G = _choose_fold(rows, feat, row_mult) if fold is None else int(fold)

    shp = (rows * G, feat // G)
    x = inp.reshape(shp)
    t = tgt.reshape(shp)
    m = mask.reshape(shp)

    mse_rows, mae_rows = _row_sums(x, t, m, elem_budget=block_elem_budget)

    if G > 1:
        mse_rows = mse_rows.reshape(rows, G).sum(axis=1)
        mae_rows = mae_rows.reshape(rows, G).sum(axis=1)

    mse = mse_rows.reshape(S, B)
    mae = mae_rows.reshape(S, B)

    if LAMBDA is not None:
        w = 1.0 + LAMBDA * jnp.arange(S, dtype=jnp.float32)
        mse = mse * w[:, None]
        mae = mae * w[:, None]

    return normal_loss_global_scale * (
        mse_weight * jnp.mean(mse) + mae_weight * jnp.mean(mae)
    )


# ---------------------------------------------------------------------------
# Pure-JAX reference (mirrors the PyTorch forward) for a sanity check.
# ---------------------------------------------------------------------------
def _reference(inp, tgt, mask, mse_weight=1.0, mae_weight=1.0,
               scale=5e-05, LAMBDA=None):
    inp = inp.astype(jnp.float32)
    tgt = tgt.astype(jnp.float32)
    w = jnp.full_like(inp, BALANCING_WEIGHTS[0])
    for i, thr in enumerate(PIXEL_THRESHOLDS):
        w = w + (BALANCING_WEIGHTS[i + 1] - BALANCING_WEIGHTS[i]) * (
            tgt >= thr
        ).astype(jnp.float32)
    w = w * mask.astype(jnp.float32)
    mse = jnp.sum(w * (inp - tgt) ** 2, axis=(2, 3, 4))
    mae = jnp.sum(w * jnp.abs(inp - tgt), axis=(2, 3, 4))
    if LAMBDA is not None:
        S = mse.shape[0]
        ww = 1.0 + LAMBDA * jnp.arange(S, dtype=jnp.float32)
        mse = mse * ww[:, None]
        mae = mae * ww[:, None]
    return scale * (mse_weight * jnp.mean(mse) + mae_weight * jnp.mean(mae))


if __name__ == "__main__":
    key = jax.random.PRNGKey(0)

    # --- Test 1: f32 inputs, uint8 mask, auto fold/tiling ------------------
    k1, k2, k3, key = jax.random.split(key, 4)
    S, B, C, H, W = 4, 2, 1, 16, 16
    inp = jax.random.uniform(k1, (S, B, C, H, W), dtype=jnp.float32)
    tgt = jax.random.uniform(k2, (S, B, C, H, W), dtype=jnp.float32)
    mask = (jax.random.uniform(k3, (S, B, C, H, W)) > 0.2).astype(jnp.uint8)

    loss = jax.block_until_ready(weighted_mse_mae_hko(inp, tgt, mask))
    ref = jax.block_until_ready(_reference(inp, tgt, mask))
    assert jnp.allclose(loss, ref, rtol=3e-5, atol=1e-7), (loss, ref)

    # --- Test 2: bf16 inputs (bf16 weight chain on v6e/v7x), LAMBDA weighting
    k1, k2, k3, key = jax.random.split(key, 4)
    S, B, C, H, W = 2, 4, 2, 16, 16
    inp = jax.random.uniform(k1, (S, B, C, H, W), dtype=jnp.float32).astype(jnp.bfloat16)
    tgt = jax.random.uniform(k2, (S, B, C, H, W), dtype=jnp.float32).astype(jnp.bfloat16)
    mask = (jax.random.uniform(k3, (S, B, C, H, W)) > 0.2).astype(jnp.uint8)

    loss = jax.block_until_ready(weighted_mse_mae_hko(inp, tgt, mask, LAMBDA=0.5))
    ref = jax.block_until_ready(_reference(inp, tgt, mask, LAMBDA=0.5))
    assert jnp.allclose(loss, ref, rtol=3e-5, atol=1e-7), (loss, ref)

    # --- Test 3: bool mask (compat path) + forced feat tiling with in-kernel
    #             tail masking (no jnp.pad) ---------------------------------
    k1, k2, k3, key = jax.random.split(key, 4)
    S, B, C, H, W = 2, 4, 1, 24, 16
    inp = jax.random.uniform(k1, (S, B, C, H, W), dtype=jnp.float32)
    tgt = jax.random.uniform(k2, (S, B, C, H, W), dtype=jnp.float32)
    mask = jax.random.uniform(k3, (S, B, C, H, W)) > 0.2

    loss = jax.block_until_ready(
        weighted_mse_mae_hko(inp, tgt, mask, fold=1, block_elem_budget=2048))
    ref = jax.block_until_ready(_reference(inp, tgt, mask))
    assert jnp.allclose(loss, ref, rtol=3e-5, atol=1e-7), (loss, ref)

    print("KERNEL_OK")
</pallas_src>

<mosaic_0001>
module attributes {stable_mosaic.version = 11 : i64} {
  func.func @kernel(%arg0: i32, %arg1: i32, %arg2: memref<32x32xf32, #tpu.memory_space<vmem>>, %arg3: memref<32x32xf32, #tpu.memory_space<vmem>>, %arg4: memref<32x32xi8, #tpu.memory_space<vmem>>, %arg5: memref<32x1xf32, #tpu.memory_space<vmem>>, %arg6: memref<32x1xf32, #tpu.memory_space<vmem>>) attributes {dimension_semantics = [#tpu.dimension_semantics<parallel>, #tpu.dimension_semantics<arbitrary>], iteration_bounds = array<i64: 2, 1>, scalar_prefetch = 0 : i64, scratch_operands = 0 : i64, tpu.core_type = #tpu.core_type<tc>, window_params = [{transform_indices = @transform_0, window_bounds = array<i64: 32, 32>}, {transform_indices = @transform_1, window_bounds = array<i64: 32, 32>}, {transform_indices = @transform_2, window_bounds = array<i64: 32, 32>}, {transform_indices = @transform_3, window_bounds = array<i64: 32, 1>}, {transform_indices = @transform_4, window_bounds = array<i64: 32, 1>}]} {
    %c0_i32 = arith.constant 0 : i32
    %0 = arith.cmpi eq, %arg1, %c0_i32 : i32
    %1 = arith.extui %0 : i1 to i32
    %c0_i32_0 = arith.constant 0 : i32
    %2 = arith.cmpi ne, %1, %c0_i32_0 : i32
    scf.if %2 {
      %cst_25 = arith.constant 0.000000e+00 : f32
      %41 = vector.broadcast %cst_25 : f32 to vector<32x1xf32>
      %c0_26 = arith.constant 0 : index
      %c0_27 = arith.constant 0 : index
      %42 = vector.load %arg5[%c0_26, %c0_27] : memref<32x1xf32, #tpu.memory_space<vmem>>, vector<32x1xf32>
      tpu.vector_store %arg5[%c0_26, %c0_27], %41 {strides = array<i32>} : memref<32x1xf32, #tpu.memory_space<vmem>>, vector<32x1xf32>,
      %cst_28 = arith.constant 0.000000e+00 : f32
      %43 = vector.broadcast %cst_28 : f32 to vector<32x1xf32>
      %c0_29 = arith.constant 0 : index
      %c0_30 = arith.constant 0 : index
      %44 = vector.load %arg6[%c0_29, %c0_30] : memref<32x1xf32, #tpu.memory_space<vmem>>, vector<32x1xf32>
      tpu.vector_store %arg6[%c0_29, %c0_30], %43 {strides = array<i32>} : memref<32x1xf32, #tpu.memory_space<vmem>>, vector<32x1xf32>,
    } else {
    }
    %c0 = arith.constant 0 : index
    %c0_1 = arith.constant 0 : index
    %3 = vector.load %arg3[%c0, %c0_1] : memref<32x32xf32, #tpu.memory_space<vmem>>, vector<32x32xf32>
    %cst = arith.constant 0.462426484 : f32
    %4 = vector.broadcast %cst : f32 to vector<32x32xf32>
    %5 = arith.cmpf oge, %3, %4 : vector<32x32xf32>
    %cst_2 = arith.constant 2.000000e+00 : f32
    %cst_3 = arith.constant 1.000000e+00 : f32
    %6 = vector.broadcast %cst_2 : f32 to vector<32x32xf32>
    %7 = vector.broadcast %cst_3 : f32 to vector<32x32xf32>
    %8 = arith.select %5, %6, %7 : vector<32x32xi1>, vector<32x32xf32>
    %cst_4 = arith.constant 0.551110268 : f32
    %9 = vector.broadcast %cst_4 : f32 to vector<32x32xf32>
    %10 = arith.cmpf oge, %3, %9 : vector<32x32xf32>
    %cst_5 = arith.constant 5.000000e+00 : f32
    %11 = vector.broadcast %cst_5 : f32 to vector<32x32xf32>
    %12 = arith.select %10, %11, %8 : vector<32x32xi1>, vector<32x32xf32>
    %cst_6 = arith.constant 0.618196904 : f32
    %13 = vector.broadcast %cst_6 : f32 to vector<32x32xf32>
    %14 = arith.cmpf oge, %3, %13 : vector<32x32xf32>
    %cst_7 = arith.constant 1.000000e+01 : f32
    %15 = vector.broadcast %cst_7 : f32 to vector<32x32xf32>
    %16 = arith.select %14, %15, %12 : vector<32x32xi1>, vector<32x32xf32>
    %cst_8 = arith.constant 0.724526822 : f32
    %17 = vector.broadcast %cst_8 : f32 to vector<32x32xf32>
    %18 = arith.cmpf oge, %3, %17 : vector<32x32xf32>
    %cst_9 = arith.constant 3.000000e+01 : f32
    %19 = vector.broadcast %cst_9 : f32 to vector<32x32xf32>
    %20 = arith.select %18, %19, %16 : vector<32x32xi1>, vector<32x32xf32>
    %c0_10 = arith.constant 0 : index
    %c0_11 = arith.constant 0 : index
    %21 = vector.load %arg4[%c0_10, %c0_11] : memref<32x32xi8, #tpu.memory_space<vmem>>, vector<32x32xi8>
    %c0_i8 = arith.constant 0 : i8
    %22 = vector.broadcast %c0_i8 : i8 to vector<32x32xi8>
    %23 = arith.cmpi ne, %21, %22 : vector<32x32xi8>
    %cst_12 = arith.constant 0.000000e+00 : f32
    %24 = vector.broadcast %cst_12 : f32 to vector<32x32xf32>
    %25 = arith.select %23, %20, %24 : vector<32x32xi1>, vector<32x32xf32>
    %c0_13 = arith.constant 0 : index
    %c0_14 = arith.constant 0 : index
    %26 = vector.load %arg2[%c0_13, %c0_14] : memref<32x32xf32, #tpu.memory_space<vmem>>, vector<32x32xf32>
    %27 = arith.subf %26, %3 : vector<32x32xf32>
    %28 = math.absf %27 : vector<32x32xf32>
    %29 = arith.mulf %25, %28 : vector<32x32xf32>
    %c0_15 = arith.constant 0 : index
    %c0_16 = arith.constant 0 : index
    %30 = vector.load %arg6[%c0_15, %c0_16] : memref<32x1xf32, #tpu.memory_space<vmem>>, vector<32x1xf32>
    %cst_17 = arith.constant dense<0.000000e+00> : vector<32xf32>
    %31 = vector.multi_reduction <add>, %29, %cst_17 [1] : vector<32x32xf32> to vector<32xf32>
    %32 = vector.shape_cast %31 : vector<32xf32> to vector<32x1xf32>
    %33 = arith.addf %30, %32 : vector<32x1xf32>
    %c0_18 = arith.constant 0 : index
    %c0_19 = arith.constant 0 : index
    %34 = vector.load %arg6[%c0_18, %c0_19] : memref<32x1xf32, #tpu.memory_space<vmem>>, vector<32x1xf32>
    tpu.vector_store %arg6[%c0_18, %c0_19], %33 {strides = array<i32>} : memref<32x1xf32, #tpu.memory_space<vmem>>, vector<32x1xf32>,
    %c0_20 = arith.constant 0 : index
    %c0_21 = arith.constant 0 : index
    %35 = vector.load %arg5[%c0_20, %c0_21] : memref<32x1xf32, #tpu.memory_space<vmem>>, vector<32x1xf32>
    %36 = arith.mulf %29, %28 : vector<32x32xf32>
    %cst_22 = arith.constant dense<0.000000e+00> : vector<32xf32>
    %37 = vector.multi_reduction <add>, %36, %cst_22 [1] : vector<32x32xf32> to vector<32xf32>
    %38 = vector.shape_cast %37 : vector<32xf32> to vector<32x1xf32>
    %39 = arith.addf %35, %38 : vector<32x1xf32>
    %c0_23 = arith.constant 0 : index
    %c0_24 = arith.constant 0 : index
    %40 = vector.load %arg5[%c0_23, %c0_24] : memref<32x1xf32, #tpu.memory_space<vmem>>, vector<32x1xf32>
    tpu.vector_store %arg5[%c0_23, %c0_24], %39 {strides = array<i32>} : memref<32x1xf32, #tpu.memory_space<vmem>>, vector<32x1xf32>,
    return
  }
  func.func @transform_0(%arg0: i32, %arg1: i32) -> (i32, i32) {
    %c0_i32 = arith.constant 0 : i32
    return %arg0, %arg1 : i32, i32
  }
  func.func @transform_1(%arg0: i32, %arg1: i32) -> (i32, i32) {
    %c0_i32 = arith.constant 0 : i32
    return %arg0, %arg1 : i32, i32
  }
  func.func @transform_2(%arg0: i32, %arg1: i32) -> (i32, i32) {
    %c0_i32 = arith.constant 0 : i32
    return %arg0, %arg1 : i32, i32
  }
  func.func @transform_3(%arg0: i32, %arg1: i32) -> (i32, i32) {
    %c0_i32 = arith.constant 0 : i32
    %c0_i32_0 = arith.constant 0 : i32
    return %arg0, %c0_i32 : i32, i32
  }
  func.func @transform_4(%arg0: i32, %arg1: i32) -> (i32, i32) {
    %c0_i32 = arith.constant 0 : i32
    %c0_i32_0 = arith.constant 0 : i32
    return %arg0, %c0_i32 : i32, i32
  }
}

</mosaic_0001>

<bundles_post_ra>
// kernel: tpu_custom_call.1
= control target key start
LH: loop header
LB: loop body
LE: loop exit
PB: predicated region body
PF: predicated region fallthrough
CT: control target
= control target key end

     0   :  { %s682_s15 = smov 0   ;;  %s684_s16 = smov 0   ;;  %s818_s0 = inlined_call_operand.vmem [shape: f32[64,32], index: 0, kind: input, shape index: {}]   ;;  %s819_s1 = inlined_call_operand.vmem [shape: f32[64,32], index: 1, kind: input, shape index: {}]   ;;  %s820_s2 = inlined_call_operand.vmem [shape: u8[64,32], index: 2, kind: input, shape index: {}]   ;;  %s821_s3 = inlined_call_operand.vmem [shape: f32[64,1], index: 3, kind: output, shape index: {0}]   ;;  %s822_s4 = inlined_call_operand.vmem [shape: f32[64,1], index: 4, kind: output, shape index: {1}]  }
   0x1   :  { %s686_s17 = smov 0  }
   0x2 LB: > { %s27_s18 = sadd.s32 1, %s648_s16  ;;  %p591_p0 = scmp.ge.s32.totalorder %s652_s17, 1  ;;  %s652_s17 = sphi %s686_s17, %s15_s17   ;;  %s648_s16 = sphi %s684_s16, %s824_s16   ;;  %s644_s15 = sphi %s682_s15, %s823_s15  }
   0x3   : > { %p29_p1 = scmp.ge.s32.totalorder %s27_s18, 2  ;;  %p213_p2 = scmp.lt.s32.totalorder %s652_s17, 3 }
   0x5   : > { %s826_s18 = smov (%p29_p1, %s27_s18), 0  ;;  %p214_p3 = pnand %p591_p0, %p213_p2 }
   0x6   : > { %s592_s19 = sshll.u32 (!%p214_p3), %s644_s15, 2  ;;  %p280_p4 = scmp.lt.s32.totalorder (!%p214_p3), %s644_s15, 1 }
   0x7   : > { %217 = sbr.rel (%p214_p3) target bundleno = 170 (0xaa), region = 32  ;;  %p263_p5 = scmp.lt.s32.totalorder (!%p214_p3), %s592_s19, 7 }
   0xc   : > { %s828_s15 = smov (!%p280_p4, %s644_s15), 1  ;;  %s830_s19 = smov (!%p263_p5, %s592_s19), 7  ;;  %v654_v3 = vmov 1.0   ;;  %v655_v5 = vmov 0   ;;  %vm405_vm7 = vcmask 261120   ;;  %v656_v55 = vmov 0.0  }
   0xd   : > { %s596_s20 = sshll.u32 %s828_s15, 3  ;;  %s700_s21 = sshll.u32 %s830_s19, 3 }
   0xe   : > { %s286_s24 = scalar_lea.vmem %s820_s2, %s596_s20  ;;  %s709_s27 = scalar_lea.vmem %s818_s0, %s700_s21 }
   0xf   : > { %s715_s30 = scalar_lea.vmem %s819_s1, %s700_s21  ;;  %v350_v0 = vld [vmem:[%s286_s24] sm:$0xff]  ;;  %v386_v7 = vld [vmem:[%s709_s27 + $0x8] sm:$0xff]  ;;  %v387_v25 = vld [vmem:[%s709_s27 + $0x10] sm:$0xff]  ;;  %s743_s7 = scalar_lea.vmem %s822_s4, %s700_s21 }
  0x10   : > { %v315_v1 = vld [vmem:[%s715_s30 + $0x8] sm:$0xff]  ;;  %vm351_vm0 = vnez %v350_v0  ;;  %v314_v2 = vld [vmem:[%s715_s30] sm:$0xff]  ;;  %v316_v9 = vld [vmem:[%s715_s30 + $0x10] sm:$0xff]  ;;  %s757_s10 = scalar_lea.vmem %s821_s3, %s700_s21 }
  0x11   : > { %vm319_vm1 = vcmp.ge.f32.partialorder %v315_v1, 0.46242648  ;;  %vm327_vm2 = vcmp.ge.f32.partialorder %v315_v1, 0.55111027  ;;  %v720_v6 = vsel %vm351_vm0, 16843009, %v655_v5  ;;  %v390_v13 = vsub.f32 %v386_v7, %v315_v1 }
  0x12   : > { %v323_v4 = vsel %vm319_vm1, 2.0, %v654_v3  ;;  %v354_v8 = vunpack.c.1.s8 %v720_v6  ;;  %vm318_vm3 = vcmp.ge.f32.partialorder %v314_v2, 0.46242648  ;;  %vm335_vm4 = vcmp.ge.f32.partialorder %v315_v1, 0.6181969  ;;  %v385_v16 = vld [vmem:[%s709_s27] sm:$0xff] }
  0x13   : > { %v331_v10 = vsel %vm327_vm2, 5.0, %v323_v4  ;;  %v322_v11 = vsel %vm318_vm3, 2.0, %v654_v3  ;;  %vm326_vm5 = vcmp.ge.f32.partialorder %v314_v2, 0.55111027  ;;  %vm343_vm6 = vcmp.ge.f32.partialorder %v315_v1, 0.7245268 }
  0x14   : > { %v359_v12 = vpack.c.b16 %v354_v8, %v354_v8  ;;  %v330_v14 = vsel %vm326_vm5, 5.0, %v322_v11  ;;  %vm334_vm8 = vcmp.ge.f32.partialorder %v314_v2, 0.6181969  ;;  %v353_v15 = vunpack.c.0.s8 %v720_v6  ;;  %v730_v26 = vld [vmem:[%s715_s30 + $0x18] sm:$0xff] }
  0x15   : > { %vm320_vm9 = vcmp.ge.f32.partialorder %v316_v9, 0.46242648  ;;  %v339_v17 = vsel %vm335_vm4, 10.0, %v331_v10  ;;  %vm328_vm10 = vcmp.ge.f32.partialorder %v316_v9, 0.55111027  ;;  %v338_v22 = vsel %vm334_vm8, 10.0, %v330_v14 }
  0x16   : > { %v360_v18 = vpack.c.b8 %v359_v12, %v359_v12  ;;  %v324_v19 = vsel %vm320_vm9, 2.0, %v654_v3  ;;  %vm342_vm11 = vcmp.ge.f32.partialorder %v314_v2, 0.7245268  ;;  %v357_v20 = vpack.c.b16 %v353_v15, %v353_v15  ;;  %v388_v50 = vld [vmem:[%s709_s27 + $0x18] sm:$0xff] }
  0x17   : > { %v332_v21 = vsel %vm328_vm10, 5.0, %v324_v19  ;;  %vm336_vm12 = vcmp.ge.f32.partialorder %v316_v9, 0.6181969  ;;  %v389_v23 = vsub.f32 %v385_v16, %v314_v2  ;;  %v355_v24 = vunpack.c.2.s8 %v720_v6 }
  0x18   : > { %vm366_vm13 = vnez %v360_v18  ;;  %v347_v27 = vsel %vm343_vm6, 30.0, %v339_v17  ;;  %v394_v29 = vand.u32 2147483647, %v390_v13  ;;  %v358_v30 = vpack.c.b8 %v357_v20, %v357_v20 }
  0x19   : > { %v370_v28 = vsel %vm366_vm13, 16843009, %v655_v5  ;;  %v340_v32 = vsel %vm336_vm12, 10.0, %v332_v21  ;;  %vm344_vm14 = vcmp.ge.f32.partialorder %v316_v9, 0.7245268  ;;  %v361_v33 = vpack.c.b16 %v355_v24, %v355_v24 }
  0x1a   : > { %v374_v31 = vunpack.c.0.s8 %v370_v28  ;;  %v346_v34 = vsel %vm342_vm11, 30.0, %v338_v22  ;;  %vm365_vm15 = vnez %v358_v30  ;;  %v391_v35 = vsub.f32 %v387_v25, %v316_v9 }
  0x1b   : > { %vm321_vm0 = vcmp.ge.f32.partialorder %v730_v26, 0.46242648  ;;  %v369_v36 = vsel %vm365_vm15, 16843009, %v655_v5  ;;  %v393_v37 = vand.u32 2147483647, %v389_v23  ;;  %v362_v38 = vpack.c.b8 %v361_v33, %v361_v33 }
  0x1c   : > { %vm378_vm1 = vcmp.ne.s32.totalorder %v374_v31, 0  ;;  %v373_v40 = vunpack.c.0.s8 %v369_v36  ;;  %v348_v41 = vsel %vm344_vm14, 30.0, %v340_v32  ;;  %vm329_vm2 = vcmp.ge.f32.partialorder %v730_v26, 0.55111027 }
  0x1d   : > { %v382_v39 = vsel %vm378_vm1, %v347_v27, 0.0  ;;  %vm367_vm3 = vnez %v362_v38  ;;  %v325_v43 = vsel %vm321_vm0, 2.0, %v654_v3  ;;  %v356_v44 = vunpack.c.3.s8 %v720_v6 }
  0x1e   : > { %v398_v42 = vmul.f32 %v394_v29, %v382_v39  ;;  %vm377_vm4 = vcmp.ne.s32.totalorder %v373_v40, 0  ;;  %v371_v45 = vsel %vm367_vm3, 16843009, %v655_v5  ;;  %v395_v46 = vand.u32 2147483647, %v391_v35 }
  0x1f   : > { %vm305_vm5 = vcmask 7168   ;;  %v381_v48 = vsel %vm377_vm4, %v346_v34, 0.0  ;;  %v375_v49 = vunpack.c.0.s8 %v371_v45  ;;  %vm337_vm6 = vcmp.ge.f32.partialorder %v730_v26, 0.6181969 }
  0x20   : > { %v409_v47 = vsel %vm405_vm7, %v398_v42, 0.0  ;;  %v397_v51 = vmul.f32 %v393_v37, %v381_v48  ;;  %v333_v52 = vsel %vm329_vm2, 5.0, %v325_v43  ;;  %v363_v53 = vpack.c.b16 %v356_v44, %v356_v44  ;;  %310 = vst.msk [vmem:[%s743_s7] sm:$0xff] %vm305_vm5, %v656_v55 }
  0x21   : > { %410 = vadd.xlane.f32.xlu1 %v409_v47  ;;  %vm379_vm8 = vcmp.ne.s32.totalorder %v375_v49, 0  ;;  %v432_v54 = vmul.f32 %v398_v42, %v394_v29  ;;  %v392_v59 = vsub.f32 %v388_v50, %v730_v26  ;;  %311 = vst.msk [vmem:[%s743_s7 + $0x8] sm:$0xff] %vm305_vm5, %v656_v55  ;;  %v341_v61 = vsel %vm337_vm6, 10.0, %v333_v52 }
  0x22   : > { %v406_v56 = vsel %vm405_vm7, %v397_v51, 0.0  ;;  %v383_v57 = vsel %vm379_vm8, %v348_v41, 0.0  ;;  %v364_v58 = vpack.c.b8 %v363_v53, %v363_v53  ;;  %vm345_vm9 = vcmp.ge.f32.partialorder %v730_v26, 0.7245268  ;;  %312 = vst.msk [vmem:[%s743_s7 + $0x10] sm:$0xff] %vm305_vm5, %v656_v55 }
  0x23   : > { %407 = vadd.xlane.f32.xlu0 %v406_v56  ;;  %v399_v60 = vmul.f32 %v395_v46, %v383_v57  ;;  %v431_v62 = vmul.f32 %v397_v51, %v393_v37  ;;  %313 = vst.msk [vmem:[%s743_s7 + $0x18] sm:$0xff] %vm305_vm5, %v656_v55  ;;  %v438_v0 = vsel %vm405_vm7, %v432_v54, 0.0  ;;  %v349_v2 = vsel %vm345_vm9, 30.0, %v341_v61 }
  0x24   : > { %vm368_vm10 = vnez %v364_v58  ;;  %306 = vst.msk [vmem:[%s757_s10] sm:$0xff] %vm305_vm5, %v656_v55  ;;  %v396_v4 = vand.u32 2147483647, %v392_v59 }
  0x25   : > { %v412_v63 = vsel %vm405_vm7, %v399_v60, 0.0  ;;  %v372_v1 = vsel %vm368_vm10, 16843009, %v655_v5  ;;  %307 = vst.msk [vmem:[%s757_s10 + $0x8] sm:$0xff] %vm305_vm5, %v656_v55  ;;  %v433_v6 = vmul.f32 %v399_v60, %v395_v46  ;;  %v435_v7 = vsel %vm405_vm7, %v431_v62, 0.0 }
  0x26   : > { %413 = vadd.xlane.f32.xlu2 %v412_v63  ;;  %v376_v3 = vunpack.c.0.s8 %v372_v1  ;;  %308 = vst.msk [vmem:[%s757_s10 + $0x10] sm:$0xff] %vm305_vm5, %v656_v55 }
  0x27   : > { %309 = vst.msk [vmem:[%s757_s10 + $0x18] sm:$0xff] %vm305_vm5, %v656_v55  ;;  %v441_v9 = vsel %vm405_vm7, %v433_v6, 0.0  ;;  %v401_v15 = vld [vmem:[%s743_s7] sm:$0xff] }
  0x28   : > { %vm380_vm11 = vcmp.ne.s32.totalorder %v376_v3, 0  ;;  %v402_v13 = vld [vmem:[%s743_s7 + $0x8] sm:$0xff] }
  0x29   : > { %439 = vadd.xlane.f32.xlu1 %v438_v0  ;;  %v384_v5 = vsel %vm380_vm11, %v349_v2, 0.0  ;;  %v403_v18 = vld [vmem:[%s743_s7 + $0x10] sm:$0xff] }
  0x2a   : > { %v400_v8 = vmul.f32 %v396_v4, %v384_v5  ;;  %v404_v19 = vld [vmem:[%s743_s7 + $0x18] sm:$0xff] }
  0x2b   : > { %436 = vadd.xlane.f32.xlu0 %v435_v7  ;;  %v427_v25 = vld [vmem:[%s757_s10] sm:$0xff] }
  0x2c   : > { %v434_v10 = vmul.f32 %v400_v8, %v396_v4  ;;  %v415_v12 = vsel %vm405_vm7, %v400_v8, 0.0  ;;  %v428_v23 = vld [vmem:[%s757_s10 + $0x8] sm:$0xff] }
  0x2d   : > { %v429_v28 = vld [vmem:[%s757_s10 + $0x10] sm:$0xff] }
  0x2e   : > { %442 = vadd.xlane.f32.xlu2 %v441_v9  ;;  %v444_v11 = vsel %vm405_vm7, %v434_v10, 0.0  ;;  %v430_v29 = vld [vmem:[%s757_s10 + $0x18] sm:$0xff] }
  0x31   : > { %445 = vadd.xlane.f32.xlu1 %v444_v11 }
  0x33   : > { %416 = vadd.xlane.f32.xlu0 %v415_v12 }
  0x94   : > { %v411_v14 = vpop.xlane.xlu1 %410 }
  0x95   : > { %v419_v16 = vadd.f32 %v411_v14, %v402_v13 }
  0x96   : > { %v408_v17 = vpop.xlane.xlu0 %407 }
  0x97   : > { %v418_v20 = vadd.f32 %v408_v17, %v401_v15  ;;  %424 = vst.msk [vmem:[%s743_s7 + $0x8] sm:$0xff] %vm305_vm5, %v419_v16 }
  0x99   : > { %v414_v21 = vpop.xlane.xlu2 %413  ;;  %423 = vst.msk [vmem:[%s743_s7] sm:$0xff] %vm305_vm5, %v418_v20 }
  0x9a   : > { %v420_v22 = vadd.f32 %v414_v21, %v403_v18 }
  0x9c   : > { %v440_v24 = vpop.xlane.xlu1 %439  ;;  %425 = vst.msk [vmem:[%s743_s7 + $0x10] sm:$0xff] %vm305_vm5, %v420_v22 }
  0x9d   : > { %v448_v26 = vadd.f32 %v440_v24, %v428_v23 }
  0x9e   : > { %v437_v27 = vpop.xlane.xlu0 %436 }
  0x9f   : > { %v447_v30 = vadd.f32 %v437_v27, %v427_v25  ;;  %452 = vst.msk [vmem:[%s757_s10 + $0x8] sm:$0xff] %vm305_vm5, %v448_v26 }
  0xa1   : > { %v443_v31 = vpop.xlane.xlu2 %442  ;;  %451 = vst.msk [vmem:[%s757_s10] sm:$0xff] %vm305_vm5, %v447_v30 }
  0xa2   : > { %v449_v32 = vadd.f32 %v443_v31, %v429_v28 }
  0xa4   : > { %v446_v33 = vpop.xlane.xlu1 %445  ;;  %453 = vst.msk [vmem:[%s757_s10 + $0x10] sm:$0xff] %vm305_vm5, %v449_v32 }
  0xa5   : > { %v450_v34 = vadd.f32 %v446_v33, %v430_v29 }
  0xa6   : > { %v417_v35 = vpop.xlane.xlu0 %416 }
  0xa7   : > { %454 = vst.msk [vmem:[%s757_s10 + $0x18] sm:$0xff] %vm305_vm5, %v450_v34  ;;  %v421_v36 = vadd.f32 %v417_v35, %v404_v19 }
  0xa9   : > { %426 = vst.msk [vmem:[%s743_s7 + $0x18] sm:$0xff] %vm305_vm5, %v421_v36 }
  0xaa PF: > { %s15_s17 = sadd.s32 1, %s652_s17   ;;  %s823_s15 = smov %s648_s16 }
  0xab   : > { %p12_p6 = scmp.ge.s32.totalorder %s15_s17, 4   ;;  %s824_s16 = smov %s826_s18 }
  0xad   :  { %14 = sbr.rel (!%p12_p6) target bundleno = 2 (0x2), region = 84 }

</bundles_post_ra>
